<compile_context>
chip_gen: v6e
topology: v6e:2x2x1
jax: 0.10.0
libtpu: 0.0.40
codegen_flags: <defaults>
</compile_context>

<pallas_src>
import jax
import jax.numpy as jnp
from jax.experimental import pallas as pl
from jax.experimental.pallas import tpu as pltpu


LANE = 128       # last-dim tiles must be multiples of 128
TM_ALIGN = 16    # batch-tile row alignment (covers bf16 (16,128) native tiling)
# Batch-tile size cap. Big enough to amortize the ~0.35 us/step overhead
# (>=85% of HBM roofline from the measured tile curve), small enough that the
# double-buffered f32 x tile fits v5e's 16 MiB default scoped VMEM with margin.
# On v7x one could sweep 1024-2048, keeping >=2 grid steps for its 2 TCs.
TM_MAX = 512


def _round_up(n, m):
    return ((n + m - 1) // m) * m


def _two_nn_kernel(x_ref, w1_ref, b1_ref, w2_ref, b2_ref, w3_ref, b3_ref, o_ref):
    # fc1 -> ReLU -> fc2 -> ReLU -> fc3, all VMEM-resident.
    # x arrives as f32 (no wrapper copy); cast to bf16 here for the MXU.
    # bf16 MXU matmuls with f32 accumulation; biases added in f32.
    x = x_ref[...].astype(jnp.bfloat16)
    h1 = jnp.dot(x, w1_ref[...], preferred_element_type=jnp.float32) + b1_ref[...]
    h1 = jnp.maximum(h1, 0.0).astype(jnp.bfloat16)
    h2 = jnp.dot(h1, w2_ref[...], preferred_element_type=jnp.float32) + b2_ref[...]
    h2 = jnp.maximum(h2, 0.0).astype(jnp.bfloat16)
    out = jnp.dot(h2, w3_ref[...], preferred_element_type=jnp.float32) + b3_ref[...]
    o_ref[...] = out.astype(o_ref.dtype)   # bf16 store, lane-dense (cls_pad = 128)


def init_params(key, in_features, num_hiddens, num_classes):
    """Deterministic synthetic params, PyTorch nn.Linear convention: W [out, in], b [out]."""
    ks = jax.random.split(key, 6)

    def lin(kw, kb, out_f, in_f):
        bound = 1.0 / jnp.sqrt(in_f)
        w = jax.random.uniform(kw, (out_f, in_f), jnp.float32, -bound, bound)
        b = jax.random.uniform(kb, (out_f,), jnp.float32, -bound, bound)
        return w, b

    w1, b1 = lin(ks[0], ks[1], num_hiddens, in_features)
    w2, b2 = lin(ks[2], ks[3], num_hiddens, num_hiddens)
    w3, b3 = lin(ks[4], ks[5], num_classes, num_hiddens)
    return {"fc1_w": w1, "fc1_b": b1,
            "fc2_w": w2, "fc2_b": b2,
            "fc3_w": w3, "fc3_b": b3}


def prepare_params(params):
    """One-time prep (at init, NOT per forward): transpose PyTorch [out, in]
    weights to [in, out], zero-pad lane dims to multiples of 128 (exact math),
    cast weights to bf16 for the MXU. Biases stay f32 (added on the f32 acc)."""
    w1, b1 = params["fc1_w"], params["fc1_b"]
    w2, b2 = params["fc2_w"], params["fc2_b"]
    w3, b3 = params["fc3_w"], params["fc3_b"]
    num_hiddens, in_features = w1.shape
    num_classes = w3.shape[0]

    in_pad = _round_up(in_features, LANE)
    hid_pad = _round_up(num_hiddens, LANE)
    cls_pad = _round_up(num_classes, LANE)

    def pad_to(a, shape):
        return jnp.pad(a, [(0, s - d) for d, s in zip(a.shape, shape)])

    return {
        # weights: [in, out] layout, zero-padded, bf16
        "w1": pad_to(w1.T, (in_pad, hid_pad)).astype(jnp.bfloat16),
        "w2": pad_to(w2.T, (hid_pad, hid_pad)).astype(jnp.bfloat16),
        "w3": pad_to(w3.T, (hid_pad, cls_pad)).astype(jnp.bfloat16),
        # biases: [1, out] f32
        "b1": pad_to(b1[None, :], (1, hid_pad)),
        "b2": pad_to(b2[None, :], (1, hid_pad)),
        "b3": pad_to(b3[None, :], (1, cls_pad)),
        "in_features": in_features,
        "num_classes": num_classes,
        "in_pad": in_pad,
        "hid_pad": hid_pad,
        "cls_pad": cls_pad,
    }


def _pick_tm(B):
    """Batch-tile rows: minimize dead padding in the ragged last block, and for
    large batches use >= 2 tiles so the parallel axis can feed both v7x TCs."""
    n_tiles = -(-B // TM_MAX)
    if B >= 2 * TM_MAX:
        n_tiles = max(n_tiles, 2)
    tm = _round_up(-(-B // n_tiles), TM_ALIGN)
    return min(tm, _round_up(B, TM_ALIGN))


def two_nn_forward(x, prepped):
    """Forward pass. x: [B, C, H, W] or [B, in_features] (f32). Returns [B, num_classes] f32."""
    if x.ndim == 4:
        x = x.reshape(x.shape[0], -1)  # same as torch .view(B, -1)
    B, in_features = x.shape
    assert in_features == prepped["in_features"]

    in_pad = prepped["in_pad"]
    hid_pad = prepped["hid_pad"]
    cls_pad = prepped["cls_pad"]

    # Feature padding only if needed (fc1 reduces over features, so ragged reads
    # there are NOT safe -- but a whole-lane-aligned in_features like 1024 needs
    # no copy at all and x streams straight from HBM as f32).
    if in_pad != in_features:
        x = jnp.pad(x, ((0, 0), (0, in_pad - in_features)))

    tm = _pick_tm(B)
    grid = (pl.cdiv(B, tm),)   # ragged last block; OOB rows discarded on write

    out = pl.pallas_call(
        _two_nn_kernel,
        out_shape=jax.ShapeDtypeStruct((B, cls_pad), jnp.bfloat16),
        grid=grid,
        in_specs=[
            # activations: one batch tile per grid step (software-pipelined DMA)
            pl.BlockSpec((tm, in_pad), lambda i: (i, 0)),
            # weights/biases: constant block index -> VMEM-resident, DMA'd once
            pl.BlockSpec((in_pad, hid_pad), lambda i: (0, 0)),
            pl.BlockSpec((1, hid_pad), lambda i: (0, 0)),
            pl.BlockSpec((hid_pad, hid_pad), lambda i: (0, 0)),
            pl.BlockSpec((1, hid_pad), lambda i: (0, 0)),
            pl.BlockSpec((hid_pad, cls_pad), lambda i: (0, 0)),
            pl.BlockSpec((1, cls_pad), lambda i: (0, 0)),
        ],
        out_specs=pl.BlockSpec((tm, cls_pad), lambda i: (i, 0)),
        compiler_params=pltpu.CompilerParams(
            dimension_semantics=("parallel",)),
    )(x, prepped["w1"], prepped["b1"], prepped["w2"], prepped["b2"],
      prepped["w3"], prepped["b3"])

    # Slice off class padding; return f32 logits (bf16-quantized final values).
    return out[:, :prepped["num_classes"]].astype(jnp.float32)


if __name__ == "__main__":
    key = jax.random.PRNGKey(0)
    k_x, k_p = jax.random.split(key)

    B, C, H, W = 2, 4, 16, 16
    in_features = C * H * W          # 1024 (multiple of 128 -> zero-copy x path)
    num_hiddens = 32
    num_classes = 10

    x = jax.random.normal(k_x, (B, C, H, W), dtype=jnp.float32)
    params = init_params(k_p, in_features, num_hiddens, num_classes)
    prepped = prepare_params(params)   # one-time transpose/pad/cast

    out = two_nn_forward(x, prepped)
    jax.block_until_ready(out)

    # Pure-JAX f32 reference. Tolerance is loose because the kernel uses bf16
    # weights/activations/output (f32 accumulation inside the MXU).
    xf = x.reshape(B, -1)
    h1 = jnp.maximum(xf @ params["fc1_w"].T + params["fc1_b"], 0.0)
    h2 = jnp.maximum(h1 @ params["fc2_w"].T + params["fc2_b"], 0.0)
    ref = h2 @ params["fc3_w"].T + params["fc3_b"]

    assert out.shape == (B, num_classes)
    assert jnp.allclose(out, ref, atol=5e-2, rtol=5e-2), float(
        jnp.max(jnp.abs(out - ref)))

    print("KERNEL_OK")
</pallas_src>

<mosaic_0001>
module attributes {stable_mosaic.version = 11 : i64} {
  func.func @_two_nn_kernel(%arg0: i32, %arg1: memref<16x1024xf32, #tpu.memory_space<vmem>>, %arg2: memref<1024x128xbf16, #tpu.memory_space<vmem>>, %arg3: memref<1x128xf32, #tpu.memory_space<vmem>>, %arg4: memref<128x128xbf16, #tpu.memory_space<vmem>>, %arg5: memref<1x128xf32, #tpu.memory_space<vmem>>, %arg6: memref<128x128xbf16, #tpu.memory_space<vmem>>, %arg7: memref<1x128xf32, #tpu.memory_space<vmem>>, %arg8: memref<16x128xbf16, #tpu.memory_space<vmem>>) attributes {dimension_semantics = [#tpu.dimension_semantics<parallel>], iteration_bounds = array<i64: 1>, scalar_prefetch = 0 : i64, scratch_operands = 0 : i64, tpu.core_type = #tpu.core_type<tc>, window_params = [{transform_indices = @transform_0, window_bounds = array<i64: 16, 1024>}, {pipeline_mode = #tpu.pipeline_mode<synchronous>, transform_indices = @transform_1, window_bounds = array<i64: 1024, 128>}, {pipeline_mode = #tpu.pipeline_mode<synchronous>, transform_indices = @transform_2, window_bounds = array<i64: 1, 128>}, {pipeline_mode = #tpu.pipeline_mode<synchronous>, transform_indices = @transform_3, window_bounds = array<i64: 128, 128>}, {pipeline_mode = #tpu.pipeline_mode<synchronous>, transform_indices = @transform_4, window_bounds = array<i64: 1, 128>}, {pipeline_mode = #tpu.pipeline_mode<synchronous>, transform_indices = @transform_5, window_bounds = array<i64: 128, 128>}, {pipeline_mode = #tpu.pipeline_mode<synchronous>, transform_indices = @transform_6, window_bounds = array<i64: 1, 128>}, {transform_indices = @transform_7, window_bounds = array<i64: 16, 128>}]} {
    %c0 = arith.constant 0 : index
    %c0_0 = arith.constant 0 : index
    %0 = vector.load %arg1[%c0, %c0_0] : memref<16x1024xf32, #tpu.memory_space<vmem>>, vector<16x1024xf32>
    %1 = arith.truncf %0 : vector<16x1024xf32> to vector<16x1024xbf16>
    %c0_1 = arith.constant 0 : index
    %c0_2 = arith.constant 0 : index
    %2 = vector.load %arg2[%c0_1, %c0_2] : memref<1024x128xbf16, #tpu.memory_space<vmem>>, vector<1024x128xbf16>
    %cst = arith.constant dense<0.000000e+00> : vector<16x128xf32>
    %3 = tpu.matmul %1, %2, %cst {dimension_numbers = #tpu.dot_dimension_numbers<[1], [0], [0], [1], [0, 0, 1, 1], [], []>} : vector<16x1024xbf16>, vector<1024x128xbf16>, vector<16x128xf32> -> vector<16x128xf32>
    %c0_3 = arith.constant 0 : index
    %c0_4 = arith.constant 0 : index
    %4 = vector.load %arg3[%c0_3, %c0_4] : memref<1x128xf32, #tpu.memory_space<vmem>>, vector<1x128xf32>
    %5 = vector.broadcast %4 : vector<1x128xf32> to vector<16x128xf32>
    %6 = arith.addf %3, %5 : vector<16x128xf32>
    %cst_5 = arith.constant 0.000000e+00 : f32
    %7 = vector.broadcast %cst_5 : f32 to vector<16x128xf32>
    %8 = arith.maximumf %6, %7 : vector<16x128xf32>
    %9 = arith.truncf %8 : vector<16x128xf32> to vector<16x128xbf16>
    %c0_6 = arith.constant 0 : index
    %c0_7 = arith.constant 0 : index
    %10 = vector.load %arg4[%c0_6, %c0_7] : memref<128x128xbf16, #tpu.memory_space<vmem>>, vector<128x128xbf16>
    %cst_8 = arith.constant dense<0.000000e+00> : vector<16x128xf32>
    %11 = tpu.matmul %9, %10, %cst_8 {dimension_numbers = #tpu.dot_dimension_numbers<[1], [0], [0], [1], [0, 0, 1, 1], [], []>} : vector<16x128xbf16>, vector<128x128xbf16>, vector<16x128xf32> -> vector<16x128xf32>
    %c0_9 = arith.constant 0 : index
    %c0_10 = arith.constant 0 : index
    %12 = vector.load %arg5[%c0_9, %c0_10] : memref<1x128xf32, #tpu.memory_space<vmem>>, vector<1x128xf32>
    %13 = vector.broadcast %12 : vector<1x128xf32> to vector<16x128xf32>
    %14 = arith.addf %11, %13 : vector<16x128xf32>
    %cst_11 = arith.constant 0.000000e+00 : f32
    %15 = vector.broadcast %cst_11 : f32 to vector<16x128xf32>
    %16 = arith.maximumf %14, %15 : vector<16x128xf32>
    %17 = arith.truncf %16 : vector<16x128xf32> to vector<16x128xbf16>
    %c0_12 = arith.constant 0 : index
    %c0_13 = arith.constant 0 : index
    %18 = vector.load %arg6[%c0_12, %c0_13] : memref<128x128xbf16, #tpu.memory_space<vmem>>, vector<128x128xbf16>
    %cst_14 = arith.constant dense<0.000000e+00> : vector<16x128xf32>
    %19 = tpu.matmul %17, %18, %cst_14 {dimension_numbers = #tpu.dot_dimension_numbers<[1], [0], [0], [1], [0, 0, 1, 1], [], []>} : vector<16x128xbf16>, vector<128x128xbf16>, vector<16x128xf32> -> vector<16x128xf32>
    %c0_15 = arith.constant 0 : index
    %c0_16 = arith.constant 0 : index
    %20 = vector.load %arg7[%c0_15, %c0_16] : memref<1x128xf32, #tpu.memory_space<vmem>>, vector<1x128xf32>
    %21 = vector.broadcast %20 : vector<1x128xf32> to vector<16x128xf32>
    %22 = arith.addf %19, %21 : vector<16x128xf32>
    %23 = arith.truncf %22 : vector<16x128xf32> to vector<16x128xbf16>
    %c0_17 = arith.constant 0 : index
    %c0_18 = arith.constant 0 : index
    %24 = vector.load %arg8[%c0_17, %c0_18] : memref<16x128xbf16, #tpu.memory_space<vmem>>, vector<16x128xbf16>
    tpu.vector_store %arg8[%c0_17, %c0_18], %23 {strides = array<i32>} : memref<16x128xbf16, #tpu.memory_space<vmem>>, vector<16x128xbf16>,
    return
  }
  func.func @transform_0(%arg0: i32) -> (i32, i32) {
    %c0_i32 = arith.constant 0 : i32
    %c0_i32_0 = arith.constant 0 : i32
    return %arg0, %c0_i32 : i32, i32
  }
  func.func @transform_1(%arg0: i32) -> (i32, i32) {
    %c0_i32 = arith.constant 0 : i32
    %c0_i32_0 = arith.constant 0 : i32
    %c0_i32_1 = arith.constant 0 : i32
    return %c0_i32, %c0_i32_0 : i32, i32
  }
  func.func @transform_2(%arg0: i32) -> (i32, i32) {
    %c0_i32 = arith.constant 0 : i32
    %c0_i32_0 = arith.constant 0 : i32
    %c0_i32_1 = arith.constant 0 : i32
    return %c0_i32, %c0_i32_0 : i32, i32
  }
  func.func @transform_3(%arg0: i32) -> (i32, i32) {
    %c0_i32 = arith.constant 0 : i32
    %c0_i32_0 = arith.constant 0 : i32
    %c0_i32_1 = arith.constant 0 : i32
    return %c0_i32, %c0_i32_0 : i32, i32
  }
  func.func @transform_4(%arg0: i32) -> (i32, i32) {
    %c0_i32 = arith.constant 0 : i32
    %c0_i32_0 = arith.constant 0 : i32
    %c0_i32_1 = arith.constant 0 : i32
    return %c0_i32, %c0_i32_0 : i32, i32
  }
  func.func @transform_5(%arg0: i32) -> (i32, i32) {
    %c0_i32 = arith.constant 0 : i32
    %c0_i32_0 = arith.constant 0 : i32
    %c0_i32_1 = arith.constant 0 : i32
    return %c0_i32, %c0_i32_0 : i32, i32
  }
  func.func @transform_6(%arg0: i32) -> (i32, i32) {
    %c0_i32 = arith.constant 0 : i32
    %c0_i32_0 = arith.constant 0 : i32
    %c0_i32_1 = arith.constant 0 : i32
    return %c0_i32, %c0_i32_0 : i32, i32
  }
  func.func @transform_7(%arg0: i32) -> (i32, i32) {
    %c0_i32 = arith.constant 0 : i32
    %c0_i32_0 = arith.constant 0 : i32
    return %arg0, %c0_i32 : i32, i32
  }
}

</mosaic_0001>

<bundles_post_ra>
// kernel: tpu_custom_call.1
= control target key start
LH: loop header
LB: loop body
LE: loop exit
PB: predicated region body
PF: predicated region fallthrough
CT: control target
= control target key end

     0   :  { %12 = vsyncpa [#allocation3], 0  ;;  %s1872_s0 = inlined_call_operand.hbm [shape: f32[2,1024], index: 0, kind: input, shape index: {}]   ;;  %s1873_s1 = inlined_call_operand.hbm [shape: bf16[1024,128], index: 1, kind: input, shape index: {}]   ;;  %s1874_s2 = inlined_call_operand.vmem [shape: f32[1,128], index: 2, kind: input, shape index: {}]   ;;  %s1875_s3 = inlined_call_operand.hbm [shape: bf16[128,128], index: 3, kind: input, shape index: {}]   ;;  %s1876_s4 = inlined_call_operand.vmem [shape: f32[1,128], index: 4, kind: input, shape index: {}]   ;;  %s1877_s5 = inlined_call_operand.hbm [shape: bf16[128,128], index: 5, kind: input, shape index: {}]   ;;  %s1878_s6 = inlined_call_operand.vmem [shape: f32[1,128], index: 6, kind: input, shape index: {}]   ;;  %s1879_s7 = inlined_call_operand.hbm [shape: bf16[2,128], index: 7, kind: output, shape index: {}]  }
   0x1   :  { %13 = vsyncpa [#allocation6], 0 }
   0x2   :  { %14 = vsyncpa [#allocation9], 0 }
   0x3   :  { %15 = vsyncpa [#allocation4], 0 }
   0x4   :  { %20 = vsyncadd [#allocation3], 1792  ;;  %s1742_s24 = smov [#allocation5]  }
   0x5   :  { %s33_s25 = sshll.u32 %s1742_s24, 4  ;;  %s34_s25 = int_to_ptr.vmem [resolvable:$true] %s33_s25 }
   0x6   :  { %s1642_s26 = scalar_lea.vmem %s34_s25, 8192  ;;  %p1647_p1 = scmp.lt.s32.totalorder %s34_s25, %s34_s25 }
   0x7   :  { %p1643_p0 = scmp.ne.s32.totalorder %s34_s25, %s1642_s26  ;;  %p1648_p2 = scmp.lt.s32.totalorder %s1642_s26, %s1642_s26 }
   0x9   :  { %p1649_p3 = por %p1648_p2, %p1647_p1 }
   0xb   :  { %p1650_p4 = pnand %p1649_p3, %p1643_p0 }
   0xd   :  { %1653 = shalt.err (!%p1650_p4)
}
   0xe   :  { %s1743_s27 = smov 64   ;;  %s1744_s28 = smov 4  }
   0xf   :  { %39 = dma.hbm_to_vmem [thread:$0]  %s1873_s1, 8192, %s34_s25, [#allocation6], %s1743_s27, %s1743_s27, %s1744_s28  }
  0x10   :  { %s1745_s8 = smov [#allocation2]  }
  0x11   :  { %s21_s9 = sshll.u32 %s1745_s8, 4  ;;  %s22_s9 = int_to_ptr.vmem [resolvable:$true] %s21_s9 }
  0x12   :  { %s1662_s10 = scalar_lea.vmem %s22_s9, 256  ;;  %s1666_s11 = scalar_lea.vmem %s22_s9, 2048 }
  0x13   :  { %p1663_p5 = scmp.ne.s32.totalorder %s22_s9, %s1662_s10  ;;  %p1667_p6 = scmp.lt.s32.totalorder %s22_s9, %s22_s9 }
  0x14   :  { %p1668_p7 = scmp.lt.s32.totalorder %s1666_s11, %s1662_s10 }
  0x16   :  { %p1669_p8 = por %p1668_p7, %p1667_p6 }
  0x18   :  { %p1670_p9 = pnand %p1669_p8, %p1663_p5 }
  0x1a   :  { %1673 = shalt.err (!%p1670_p9)
}
  0x1b   :  { %s1746_s12 = smov 256   ;;  %s1747_s13 = smov 16  }
  0x1c   :  { %27 = dma.hbm_to_vmem [thread:$0]  %s1872_s0, 256, %s22_s9, [#allocation3], %s1746_s12, %s1746_s12, %s1747_s13  }
  0x1d   :  { %s1748_s16 = smov [#allocation7]   ;;  %s1749_s17 = smov [#allocation8]  }
  0x1e   :  { %s47_s1 = sshll.u32 %s1748_s16, 4  ;;  %s61_s18 = sshll.u32 %s1749_s17, 4  ;;  %s48_s1 = int_to_ptr.vmem [resolvable:$true] %s47_s1  ;;  %s62_s18 = int_to_ptr.vmem [resolvable:$true] %s61_s18 }
  0x1f   :  { %s1682_s19 = scalar_lea.vmem %s48_s1, 1024  ;;  %p1687_p11 = scmp.lt.s32.totalorder %s48_s1, %s48_s1 }
  0x20   :  { %p1683_p10 = scmp.ne.s32.totalorder %s48_s1, %s1682_s19  ;;  %p1688_p12 = scmp.lt.s32.totalorder %s1682_s19, %s1682_s19 }
  0x22   :  { %p1689_p13 = por %p1688_p12, %p1687_p11 }
  0x24   :  { %p1690_p0 = pnand %p1689_p13, %p1683_p10 }
  0x26   :  { %1693 = shalt.err (!%p1690_p0)
}
  0x27   :  { %53 = dma.hbm_to_vmem [thread:$0]  %s1875_s3, 1024, %s48_s1, [#allocation6], %s1743_s27, %s1743_s27, %s1744_s28  }
  0x28   :  { %s1702_s0 = scalar_lea.vmem %s62_s18, 1024  ;;  %p1707_p2 = scmp.lt.s32.totalorder %s62_s18, %s62_s18 }
  0x29   :  { %p1703_p1 = scmp.ne.s32.totalorder %s62_s18, %s1702_s0  ;;  %p1708_p3 = scmp.lt.s32.totalorder %s1702_s0, %s1702_s0 }
  0x2b   :  { %p1709_p4 = por %p1708_p3, %p1707_p2 }
  0x2d   :  { %p1710_p5 = pnand %p1709_p4, %p1703_p1 }
  0x2f   :  { %1713 = shalt.err (!%p1710_p5)
}
  0x30   :  { %67 = dma.hbm_to_vmem [thread:$0]  %s1877_s5, 1024, %s62_s18, [#allocation9], %s1743_s27, %s1743_s27, %s1744_s28  }
  0x31   :  { %1734 = dma.done.wait [#allocation3], 2048  }
  0x32   :  { %1735 = vsyncadd [#allocation3], 4294965248 }
  0x33   :  { %1736 = dma.done.wait [#allocation6], 9216  }
  0x34   :  { %1737 = vsyncadd [#allocation6], 4294958080 }
  0x35   :  { %1738 = dma.done.wait [#allocation9], 1024  }
  0x36   :  { %1739 = vsyncadd [#allocation9], 4294966272  ;;  %v1530_v0 = vld [vmem:[#allocation5 + $0x78] sm:$0xff]   ;;  %v1534_v4 = vld [vmem:[#allocation5 + $0x70] sm:$0xff]   ;;  %v1750_v25 = vmov 1983009808   ;;  %v122_v27 = vlaneseq }
  0x37   :  { %v1531_v1 = vld [vmem:[#allocation5 + $0xf8] sm:$0xff]   ;;  %1370 = vmatprep.subr.bf16.mxu0 %v1530_v0  ;;  %v1535_v5 = vld [vmem:[#allocation5 + $0xf0] sm:$0xff]   ;;  %v1538_v8 = vld [vmem:[#allocation5 + $0x68] sm:$0xff]   ;;  %v120_v26 = vunpack.c.l.s4 %v1750_v25  ;;  %vm1752_vm0 = vmmov 0  }
  0x38   :  { %v1532_v2 = vld [vmem:[#allocation5 + $0x38] sm:$0xff]   ;;  %1392 = vmatprep.subr.bf16.mxu1 %v1531_v1  ;;  %v1536_v6 = vld [vmem:[#allocation5 + $0x30] sm:$0xff]   ;;  %v1539_v9 = vld [vmem:[#allocation5 + $0xe8] sm:$0xff]   ;;  %v1818_v33 = vshrl.u32 %v122_v27, 7 }
  0x39   :  { %v1533_v3 = vld [vmem:[#allocation5 + $0xb8] sm:$0xff]   ;;  %1371 = vmatpush3.bf16.msra.mxu0 %v1532_v2  ;;  %v1537_v7 = vld [vmem:[#allocation5 + $0xb0] sm:$0xff]   ;;  %v1540_v10 = vld [vmem:[#allocation5 + $0x28] sm:$0xff]   ;;  %v121_v32 = vunpack.c.0.s8 %v120_v26 }
  0x3a   :  { %1393 = vmatpush3.bf16.msra.mxu1 %v1533_v3  ;;  %1372 = vmatprep.subr.bf16.mxu0 %v1534_v4  ;;  %v1541_v11 = vld [vmem:[#allocation5 + $0xa8] sm:$0xff]   ;;  %v1542_v12 = vld [vmem:[#allocation5 + $0x60] sm:$0xff]   ;;  %v1546_v16 = vld [vmem:[#allocation5 + $0x58] sm:$0xff]  }
  0x3b   :  { %1394 = vmatprep.subr.bf16.mxu1 %v1535_v5  ;;  %v1543_v13 = vld [vmem:[#allocation5 + $0xe0] sm:$0xff]   ;;  %v1547_v17 = vld [vmem:[#allocation5 + $0xd8] sm:$0xff]   ;;  %v1550_v20 = vld [vmem:[#allocation5 + $0x50] sm:$0xff]   ;;  %v1821_v37 = vsub.s32 %v121_v32, %v1818_v33 }
  0x3c   :  { %v1544_v14 = vld [vmem:[#allocation5 + $0x20] sm:$0xff]   ;;  %v1548_v18 = vld [vmem:[#allocation5 + $0x18] sm:$0xff]   ;;  %v1551_v21 = vld [vmem:[#allocation5 + $0xd0] sm:$0xff]  }
  0x3d   :  { %1373 = vmatpush3.bf16.msra.mxu0 %v1536_v6  ;;  %v1545_v15 = vld [vmem:[#allocation5 + $0xa0] sm:$0xff]   ;;  %v1549_v19 = vld [vmem:[#allocation5 + $0x98] sm:$0xff]   ;;  %v1552_v22 = vld [vmem:[#allocation5 + $0x10] sm:$0xff]  }
  0x3e   :  { %1395 = vmatpush3.bf16.msra.mxu1 %v1537_v7  ;;  %1374 = vmatprep.subr.bf16.mxu0 %v1538_v8  ;;  %v1553_v23 = vld [vmem:[#allocation5 + $0x90] sm:$0xff]   ;;  %v1554_v24 = vld [vmem:[#allocation5 + $0x48] sm:$0xff]   ;;  %v1558_v31 = vld [vmem:[#allocation5 + $0x40] sm:$0xff]  }
  0x3f   :  { %1396 = vmatprep.subr.bf16.mxu1 %v1539_v9  ;;  %v1555_v28 = vld [vmem:[#allocation5 + $0xc8] sm:$0xff]   ;;  %v1559_v34 = vld [vmem:[#allocation5 + $0xc0] sm:$0xff]   ;;  %v1574_v53 = vld [vmem:[#allocation5 + $0x178] sm:$0xff]  }
  0x40   :  { %v1556_v29 = vld [vmem:[#allocation5 + $0x8] sm:$0xff]   ;;  %v1560_v35 = vld [vmem:[#allocation5] sm:$0xff]   ;;  %v1575_v58 = vld [vmem:[#allocation5 + $0x1f8] sm:$0xff]  }
  0x41   :  { %1375 = vmatpush3.bf16.msra.mxu0 %v1540_v10  ;;  %v1557_v30 = vld [vmem:[#allocation5 + $0x88] sm:$0xff]   ;;  %v1561_v36 = vld [vmem:[#allocation5 + $0x80] sm:$0xff]   ;;  %v1576_v62 = vld [vmem:[#allocation5 + $0x138] sm:$0xff]  }
  0x42   :  { %1397 = vmatpush3.bf16.msra.mxu1 %v1541_v11  ;;  %1376 = vmatprep.subr.bf16.mxu0 %v1542_v12  ;;  %v1562_v38 = vld [vmem:[#allocation2] ss:$16 sps:$4 sm:$0xff]   ;;  %v1570_v43 = vld [vmem:[#allocation2 + $0x4] ss:$16 sps:$4 sm:$0xff]   ;;  %v1577_v2 = vld [vmem:[#allocation5 + $0x1b8] sm:$0xff]  }
  0x43   :  { %1398 = vmatprep.subr.bf16.mxu1 %v1543_v13  ;;  %v1564_v39 = vld [vmem:[#allocation2 + $0x20] ss:$16 sps:$4 sm:$0xff]   ;;  %v125_v42 = vrot.slane %v1562_v38, %v1821_v37  ;;  %v1571_v44 = vld [vmem:[#allocation2 + $0x24] ss:$16 sps:$4 sm:$0xff]   ;;  %v132_v50 = vrot.slane %v1570_v43, %v1821_v37  ;;  %v1582_v10 = vld [vmem:[#allocation5 + $0x168] sm:$0xff]  }
  0x44   :  { %v1566_v40 = vld [vmem:[#allocation2 + $0x40] ss:$16 sps:$4 sm:$0xff]   ;;  %v1572_v45 = vld [vmem:[#allocation2 + $0x44] ss:$16 sps:$4 sm:$0xff]   ;;  %v139_v46 = vrot.slane %v1564_v39, %v1821_v37  ;;  %v146_v51 = vrot.slane %v1571_v44, %v1821_v37  ;;  %v1583_v11 = vld [vmem:[#allocation5 + $0x1e8] sm:$0xff]  }
  0x45   :  { %1377 = vmatpush3.bf16.msra.mxu0 %v1544_v14  ;;  %v1568_v41 = vld [vmem:[#allocation2 + $0x60] ss:$16 sps:$4 sm:$0xff]   ;;  %v197_v47 = vrot.slane %v1566_v40, %v1821_v37  ;;  %v1573_v49 = vld [vmem:[#allocation2 + $0x64] ss:$16 sps:$4 sm:$0xff]   ;;  %v204_v52 = vrot.slane %v1572_v45, %v1821_v37  ;;  %v1584_v12 = vld [vmem:[#allocation5 + $0x128] sm:$0xff]  }
  0x46   :  { %1399 = vmatpush3.bf16.msra.mxu1 %v1545_v15  ;;  %1378 = vmatprep.subr.bf16.mxu0 %v1546_v16  ;;  %v211_v48 = vrot.slane %v1568_v41, %v1821_v37  ;;  %v148_v54 = vcombine.high %v125_v42, %v139_v46  ;;  %v218_v56 = vrot.slane %v1573_v49, %v1821_v37  ;;  %v1578_v4 = vld [vmem:[#allocation5 + $0x170] sm:$0xff]   ;;  %v1585_v13 = vld [vmem:[#allocation5 + $0x1a8] sm:$0xff]   ;;  %v1586_v14 = vld [vmem:[#allocation5 + $0x160] sm:$0xff]  }
  0x47   :  { %1400 = vmatprep.subr.bf16.mxu1 %v1547_v17  ;;  %v147_v57 = vcombine.low %v125_v42, %v139_v46  ;;  %v150_v59 = vcombine.high %v132_v50, %v146_v51  ;;  %v149_v61 = vcombine.low %v132_v50, %v146_v51  ;;  %v1579_v7 = vld [vmem:[#allocation5 + $0x1f0] sm:$0xff]   ;;  %v1587_v15 = vld [vmem:[#allocation5 + $0x1e0] sm:$0xff]   ;;  %v1598_v26 = vld [vmem:[#allocation5 + $0x148] sm:$0xff]  }
  0x48   :  { %v220_v55 = vcombine.high %v197_v47, %v211_v48  ;;  %v219_v60 = vcombine.low %v197_v47, %v211_v48  ;;  %v222_v0 = vcombine.high %v204_v52, %v218_v56  ;;  %v221_v1 = vcombine.low %v204_v52, %v218_v56  ;;  %v1580_v8 = vld [vmem:[#allocation5 + $0x130] sm:$0xff]   ;;  %v1588_v16 = vld [vmem:[#allocation5 + $0x120] sm:$0xff]   ;;  %v1599_v27 = vld [vmem:[#allocation5 + $0x1c8] sm:$0xff]  }
  0x49   :  { %1379 = vmatpush3.bf16.msra.mxu0 %v1548_v18  ;;  %v1581_v9 = vld [vmem:[#allocation5 + $0x1b0] sm:$0xff]   ;;  %v1589_v17 = vld [vmem:[#allocation5 + $0x1a0] sm:$0xff]   ;;  %v1590_v18 = vld [vmem:[#allocation5 + $0x158] sm:$0xff]  }
  0x4a   :  { %1401 = vmatpush3.bf16.msra.mxu1 %v1549_v19  ;;  %1380 = vmatprep.subr.bf16.mxu0 %v1550_v20  ;;  %v276_v63 = vpack.c.bf16 %v220_v55, %v148_v54  ;;  %v275_v3 = vpack.c.bf16 %v219_v60, %v147_v57  ;;  %v278_v5 = vpack.c.bf16 %v222_v0, %v150_v59  ;;  %v1591_v19 = vld [vmem:[#allocation5 + $0x1d8] sm:$0xff]   ;;  %v1597_v25 = vld [vmem:[#allocation5 + $0x190] sm:$0xff]   ;;  %v1604_v32 = vld [vmem:[#allocation5 + $0x100] sm:$0xff]  }
  0x4b   :  { %1402 = vmatprep.subr.bf16.mxu1 %v1551_v21  ;;  %v277_v6 = vpack.c.bf16 %v221_v1, %v149_v61  ;;  %v1592_v20 = vld [vmem:[#allocation5 + $0x118] sm:$0xff]   ;;  %v1751_v1 = vmov 0.0  }
  0x4c   :  { %834 = vmatprep.mubr.bf16.mxu0 %v276_v63  ;;  %875 = vmatprep.mubr.bf16.mxu1 %v278_v5  ;;  %v1593_v21 = vld [vmem:[#allocation5 + $0x198] sm:$0xff]   ;;  %v1623_v5 = vld [vmem:[#allocation7 + $0x10] sm:$0xff]  }
  0x4d   :  { %1381 = vmatpush3.bf16.msra.mxu0 %v1552_v22  ;;  %v1594_v22 = vld [vmem:[#allocation5 + $0x150] sm:$0xff]   ;;  %v1610_v38 = vld [vmem:[#allocation2 + $0x48] ss:$16 sps:$4 sm:$0xff]   ;;  %v1614_v40 = vld [vmem:[#allocation2 + $0xc] ss:$16 sps:$4 sm:$0xff]  }
  0x4e   :  { %1403 = vmatpush3.bf16.msra.mxu1 %v1553_v23  ;;  %1382 = vmatprep.subr.bf16.mxu0 %v1554_v24  ;;  %v1595_v23 = vld [vmem:[#allocation5 + $0x1d0] sm:$0xff]   ;;  %v1612_v39 = vld [vmem:[#allocation2 + $0x68] ss:$16 sps:$4 sm:$0xff]   ;;  %v1615_v41 = vld [vmem:[#allocation2 + $0x2c] ss:$16 sps:$4 sm:$0xff]   ;;  %v233_v44 = vrot.slane %v1610_v38, %v1821_v37  ;;  %v168_v48 = vrot.slane %v1614_v40, %v1821_v37 }
  0x4f   :  { %1404 = vmatprep.subr.bf16.mxu1 %v1555_v28  ;;  %v1596_v24 = vld [vmem:[#allocation5 + $0x110] sm:$0xff]   ;;  %v1600_v28 = vld [vmem:[#allocation5 + $0x108] sm:$0xff]   ;;  %v247_v47 = vrot.slane %v1612_v39, %v1821_v37  ;;  %v182_v49 = vrot.slane %v1615_v41, %v1821_v37  ;;  %v1618_v0 = vld [vmem:[#allocation7 + $0x38] sm:$0xff]  }
  0x50   :  { %v1616_v45 = vld [vmem:[#allocation2 + $0x4c] ss:$16 sps:$4 sm:$0xff]  }
  0x51   :  { %1383 = vmatpush3.bf16.msra.mxu0 %v1556_v29  ;;  %v1601_v29 = vld [vmem:[#allocation5 + $0x188] sm:$0xff]   ;;  %v240_v51 = vrot.slane %v1616_v45, %v1821_v37  ;;  %v256_v54 = vcombine.high %v233_v44, %v247_v47  ;;  %v186_v55 = vcombine.high %v168_v48, %v182_v49  ;;  %v255_v56 = vcombine.low %v233_v44, %v247_v47 }
  0x52   :  { %1405 = vmatpush3.bf16.msra.mxu1 %v1557_v30  ;;  %1384 = vmatprep.subr.bf16.mxu0 %v1558_v31  ;;  %v1602_v30 = vld [vmem:[#allocation5 + $0x140] sm:$0xff]   ;;  %v1617_v46 = vld [vmem:[#allocation2 + $0x6c] ss:$16 sps:$4 sm:$0xff]   ;;  %v185_v57 = vcombine.low %v168_v48, %v182_v49 }
  0x53   :  { %1406 = vmatprep.subr.bf16.mxu1 %v1559_v34  ;;  %v1603_v31 = vld [vmem:[#allocation5 + $0x1c0] sm:$0xff]   ;;  %v254_v52 = vrot.slane %v1617_v46, %v1821_v37 }
  0x54   :  { %v1605_v34 = vld [vmem:[#allocation5 + $0x180] sm:$0xff]  }
  0x55   :  { %1385 = vmatpush3.bf16.msra.mxu0 %v1560_v35  ;;  %v1606_v35 = vld [vmem:[#allocation2 + $0x8] ss:$16 sps:$4 sm:$0xff]   ;;  %v257_v59 = vcombine.low %v240_v51, %v254_v52 }
  0x56   :  { %1407 = vmatpush3.bf16.msra.mxu1 %v1561_v36  ;;  %1414 = vmatprep.subr.bf16.mxu0 %v1574_v53  ;;  %v1608_v36 = vld [vmem:[#allocation2 + $0x28] ss:$16 sps:$4 sm:$0xff]   ;;  %v161_v42 = vrot.slane %v1606_v35, %v1821_v37 }
  0x57   :  { %1436 = vmatprep.subr.bf16.mxu1 %v1575_v58  ;;  %v175_v43 = vrot.slane %v1608_v36, %v1821_v37  ;;  %v258_v58 = vcombine.high %v240_v51, %v254_v52  ;;  %v281_v63 = vpack.c.bf16 %v257_v59, %v185_v57  ;;  %v1619_v37 = vld [vmem:[#allocation7 + $0x30] sm:$0xff]   ;;  %v1632_v52 = vld [vmem:[#allocation8 + $0x8] sm:$0xff]  }
  0x58   :  { %835 = vmatmul.mubr.bf16.vlgmr.msra.gmra.mxu0 %v275_v3  ;;  %v1621_v3 = vld [vmem:[#allocation7 + $0x20] sm:$0xff]   ;;  %v1631_v51 = vld [vmem:[#allocation8 + $0x10] sm:$0xff]  }
  0x59   :  { %1415 = vmatpush3.bf16.msra.mxu0 %v1576_v62  ;;  %876 = vmatmul.mubr.bf16.vlgmr.msra.gmra.mxu1 %v277_v6  ;;  %v184_v50 = vcombine.high %v161_v42, %v175_v43  ;;  %v183_v53 = vcombine.low %v161_v42, %v175_v43  ;;  %v282_v62 = vpack.c.bf16 %v258_v58, %v186_v55  ;;  %v1624_v6 = vld [vmem:[#allocation7 + $0x8] sm:$0xff]  }
  0x5a   :  { %1416 = vmatprep.subr.bf16.mxu0 %v1578_v4  ;;  %1437 = vmatpush3.bf16.msra.mxu1 %v1577_v2  ;;  %v1620_v2 = vld [vmem:[#allocation7 + $0x28] sm:$0xff]   ;;  %v1622_v4 = vld [vmem:[#allocation7 + $0x18] sm:$0xff]  }
  0x5b   :  { %1438 = vmatprep.subr.bf16.mxu1 %v1579_v7  ;;  %v280_v60 = vpack.c.bf16 %v256_v54, %v184_v50  ;;  %v279_v61 = vpack.c.bf16 %v255_v56, %v183_v53  ;;  %957 = vmatprep.mubr.bf16.mxu1 %v282_v62  ;;  %v1625_v7 = vld [vmem:[#allocation7] sm:$0xff]  }
  0x5c   :  { %v1633_v53 = vld [vmem:[#allocation8] sm:$0xff]  }
  0x5d   :  { %1417 = vmatpush3.bf16.msra.mxu0 %v1580_v8  ;;  %916 = vmatprep.mubr.bf16.mxu0 %v280_v60  ;;  %v1626_v8 = vld [vmem:[#allocation8 + $0x38] sm:$0xff]   ;;  %v1347_v54 = vld [vmem:[%s1876_s4] ss:$0 sm:$0xff] }
  0x5e   :  { %1418 = vmatprep.subr.bf16.mxu0 %v1582_v10  ;;  %1439 = vmatpush3.bf16.msra.mxu1 %v1581_v9  ;;  %v1627_v9 = vld [vmem:[#allocation8 + $0x30] sm:$0xff]   ;;  %v1628_v10 = vld [vmem:[#allocation8 + $0x28] sm:$0xff]  }
  0x5f   :  { %1440 = vmatprep.subr.bf16.mxu1 %v1583_v11  ;;  %v1629_v11 = vld [vmem:[#allocation8 + $0x20] sm:$0xff]  }
  0x61   :  { %1419 = vmatpush3.bf16.msra.mxu0 %v1584_v12  ;;  %v1630_v12 = vld [vmem:[#allocation8 + $0x18] sm:$0xff]  }
  0x62   :  { %1420 = vmatprep.subr.bf16.mxu0 %v1586_v14  ;;  %1441 = vmatpush3.bf16.msra.mxu1 %v1585_v13 }
  0x63   :  { %1442 = vmatprep.subr.bf16.mxu1 %v1587_v15 }
  0x65   :  { %1421 = vmatpush3.bf16.msra.mxu0 %v1588_v16 }
  0x66   :  { %1422 = vmatprep.subr.bf16.mxu0 %v1590_v18  ;;  %1443 = vmatpush3.bf16.msra.mxu1 %v1589_v17 }
  0x67   :  { %1444 = vmatprep.subr.bf16.mxu1 %v1591_v19 }
  0x69   :  { %1423 = vmatpush3.bf16.msra.mxu0 %v1592_v20  ;;  %v1282_v20 = vld [vmem:[%s1874_s2] ss:$0 sm:$0xff] }
  0x6a   :  { %1424 = vmatprep.subr.bf16.mxu0 %v1594_v22  ;;  %1445 = vmatpush3.bf16.msra.mxu1 %v1593_v21 }
  0x6b   :  { %1446 = vmatprep.subr.bf16.mxu1 %v1595_v23 }
  0x6d   :  { %1425 = vmatpush3.bf16.msra.mxu0 %v1596_v24 }
  0x6e   :  { %1426 = vmatprep.subr.bf16.mxu0 %v1598_v26  ;;  %1447 = vmatpush3.bf16.msra.mxu1 %v1597_v25 }
  0x6f   :  { %1448 = vmatprep.subr.bf16.mxu1 %v1599_v27 }
  0x71   :  { %1427 = vmatpush3.bf16.msra.mxu0 %v1600_v28 }
  0x72   :  { %1428 = vmatprep.subr.bf16.mxu0 %v1602_v30  ;;  %1449 = vmatpush3.bf16.msra.mxu1 %v1601_v29 }
  0x73   :  { %1450 = vmatprep.subr.bf16.mxu1 %v1603_v31 }
  0x75   :  { %1429 = vmatpush3.bf16.msra.mxu0 %v1604_v32 }
  0x76   :  { %1451 = vmatpush3.bf16.msra.mxu1 %v1605_v34  ;;  %1476 = vmatprep.subr.bf16.mxu0 %v1751_v1 }
  0x77   :  { %1496 = vmatprep.subr.bf16.mxu1 %v1751_v1 }
  0x78   :  { %917 = vmatmul.mubr.bf16.vlgmr.msra.gmra.mxu0 %v279_v61 }
  0x79   :  { %958 = vmatmul.mubr.bf16.vlgmr.msra.gmra.mxu1 %v281_v63  ;;  %1477 = vmatpush3.bf16.msra.mxu0 %v1618_v0  ;;  %v1753_v0 = vmov 1966171168  }
  0x7a   :  { %1478 = vmatprep.subr.bf16.mxu0 %v1751_v1  ;;  %1492 = vmatprep.mubr.msk.bf16.mxu0 %vm1752_vm0, %v1751_v1 }
  0x7b   :  { %1512 = vmatprep.mubr.msk.bf16.mxu1 %vm1752_vm0, %v1751_v1  ;;  %1497 = vmatpush3.bf16.msra.mxu1 %v1626_v8 }
  0x7c   :  { %1498 = vmatprep.subr.bf16.mxu1 %v1751_v1 }
  0x7d   :  { %1479 = vmatpush3.bf16.msra.mxu0 %v1619_v37  ;;  %v1200_v37 = vunpack.c.l.s4 %v1753_v0 }
  0x7e   :  { %1480 = vmatprep.subr.bf16.mxu0 %v1751_v1 }
  0x7f   :  { %1499 = vmatpush3.bf16.msra.mxu1 %v1627_v9 }
  0x80   :  { %1500 = vmatprep.subr.bf16.mxu1 %v1751_v1 }
  0x81   :  { %1481 = vmatpush3.bf16.msra.mxu0 %v1620_v2 }
  0x82   :  { %1482 = vmatprep.subr.bf16.mxu0 %v1751_v1 }
  0x83   :  { %1501 = vmatpush3.bf16.msra.mxu1 %v1628_v10 }
  0x84   :  { %1502 = vmatprep.subr.bf16.mxu1 %v1751_v1 }
  0x85   :  { %1483 = vmatpush3.bf16.msra.mxu0 %v1621_v3  ;;  %v1356_v3 = vld [vmem:[%s1878_s6] ss:$0 sm:$0xff] }
  0x86   :  { %1484 = vmatprep.subr.bf16.mxu0 %v1751_v1 }
  0x87   :  { %1503 = vmatpush3.bf16.msra.mxu1 %v1629_v11 }
  0x88   :  { %1504 = vmatprep.subr.bf16.mxu1 %v1751_v1 }
  0x89   :  { %1485 = vmatpush3.bf16.msra.mxu0 %v1622_v4 }
  0x8a   :  { %1486 = vmatprep.subr.bf16.mxu0 %v1751_v1 }
  0x8b   :  { %1505 = vmatpush3.bf16.msra.mxu1 %v1630_v12 }
  0x8c   :  { %1506 = vmatprep.subr.bf16.mxu1 %v1751_v1 }
  0x8d   :  { %1487 = vmatpush3.bf16.msra.mxu0 %v1623_v5 }
  0x8e   :  { %1488 = vmatprep.subr.bf16.mxu0 %v1751_v1 }
  0x8f   :  { %1507 = vmatpush3.bf16.msra.mxu1 %v1631_v51 }
  0x90   :  { %1508 = vmatprep.subr.bf16.mxu1 %v1751_v1 }
  0x91   :  { %1489 = vmatpush3.bf16.msra.mxu0 %v1624_v6 }
  0x92   :  { %1490 = vmatprep.subr.bf16.mxu0 %v1751_v1 }
  0x93   :  { %1509 = vmatpush3.bf16.msra.mxu1 %v1632_v52 }
  0x94   :  { %1510 = vmatprep.subr.bf16.mxu1 %v1751_v1  ;;  %v1201_v1 = vunpack.c.0.s8 %v1200_v37 }
  0x95   :  { %1491 = vmatpush3.bf16.msra.mxu0 %v1625_v7 }
  0x96   :  { %v1204_v8 = vsub.s32 %v1201_v1, %v1818_v33 }
  0x97   :  { %1511 = vmatpush3.bf16.msra.mxu1 %v1633_v53 }
 0x118   :  { %v1386_v13 = vpop.f32.mrf.mxu0 }
 0x119   :  { %v1408_v14 = vpop.f32.mrf.mxu1 }
 0x11a   :  { %v1387_v15 = vpop.f32.mrf.mxu0 }
 0x11b   :  { %v1409_v16 = vpop.f32.mrf.mxu1  ;;  %v1388_v18 = vadd.f32 %v1387_v15, %v1386_v13 }
 0x11c   :  { %v1389_v17 = vpop.f32.mrf.mxu0  ;;  %v1410_v23 = vadd.f32 %v1409_v16, %v1408_v14 }
 0x11d   :  { %v1411_v19 = vpop.f32.mrf.mxu1  ;;  %v837_v22 = vadd.f32 %v1388_v18, %v1282_v20 }
 0x11e   :  { %v1390_v21 = vpop.f32.mrf.mxu0 }
 0x11f   :  { %v1391_v24 = vadd.f32 %v1390_v21, %v1389_v17  ;;  %v1412_v25 = vpop.f32.mrf.mxu1  ;;  %v878_v29 = vadd.f32 %v1410_v23, %v837_v22 }
 0x120   :  { %v1413_v35 = vadd.f32 %v1412_v25, %v1411_v19 }
 0x121   :  { %v840_v30 = vadd.f32 %v1391_v24, %v1282_v20 }
 0x123   :  { %v881_v40 = vadd.f32 %v1413_v35, %v840_v30 }
 0x138   :  { %v1430_v26 = vpop.f32.mrf.mxu0 }
 0x139   :  { %v1452_v27 = vpop.f32.mrf.mxu1 }
 0x13a   :  { %v1431_v28 = vpop.f32.mrf.mxu0 }
 0x13b   :  { %v1432_v31 = vadd.f32 %v1431_v28, %v1430_v26  ;;  %v1453_v32 = vpop.f32.mrf.mxu1 }
 0x13c   :  { %v1433_v34 = vpop.f32.mrf.mxu0  ;;  %v1454_v41 = vadd.f32 %v1453_v32, %v1452_v27 }
 0x13d   :  { %v919_v36 = vadd.f32 %v1432_v31, %v878_v29  ;;  %v1455_v38 = vpop.f32.mrf.mxu1 }
 0x13e   :  { %v1434_v39 = vpop.f32.mrf.mxu0 }
 0x13f   :  { %v1435_v42 = vadd.f32 %v1434_v39, %v1433_v34  ;;  %v1456_v43 = vpop.f32.mrf.mxu1  ;;  %v960_v44 = vadd.f32 %v1454_v41, %v919_v36 }
 0x140   :  { %v1457_v46 = vadd.f32 %v1456_v43, %v1455_v38 }
 0x141   :  { %v922_v45 = vadd.f32 %v1435_v42, %v881_v40  ;;  %v966_v48 = vmax.f32 %v960_v44, 0.0 }
 0x143   :  { %v963_v47 = vadd.f32 %v1457_v46, %v922_v45 }
 0x145   :  { %v967_v49 = vmax.f32 %v963_v47, 0.0 }
 0x147   :  { %v968_v50 = vpack.c.bf16 %v967_v49, %v966_v48 }
 0x149   :  { %1493 = vmatmul.mubr.bf16.vlgmr.msra.gmra.mxu0 %v968_v50 }
 0x209   :  { %v1074_v55 = vpop.f32.mrf.mxu0 }
 0x20a   :  { %v1075_v57 = vadd.f32 %v1347_v54, %v1074_v55 }
 0x20b   :  { %v1494_v56 = vpop.f32.mrf.mxu0 }
 0x20c   :  { %v1081_v61 = vmax.f32 %v1075_v57, 0.0 }
 0x20d   :  { %v1077_v58 = vpop.f32.mrf.mxu0 }
 0x20e   :  { %v1078_v59 = vadd.f32 %v1347_v54, %v1077_v58 }
 0x20f   :  { %v1495_v60 = vpop.f32.mrf.mxu0 }
 0x210   :  { %v1082_v62 = vmax.f32 %v1078_v59, 0.0 }
 0x212   :  { %v1083_v63 = vpack.c.bf16 %v1082_v62, %v1081_v61 }
 0x214   :  { %1513 = vmatmul.mubr.bf16.vlgmr.msra.gmra.mxu1 %v1083_v63 }
 0x2d4   :  { %v1189_v2 = vpop.f32.mrf.mxu1 }
 0x2d5   :  { %v1190_v6 = vadd.f32 %v1356_v3, %v1189_v2 }
 0x2d6   :  { %v1514_v4 = vpop.f32.mrf.mxu1 }
 0x2d8   :  { %v1192_v5 = vpop.f32.mrf.mxu1 }
 0x2d9   :  { %v1193_v7 = vadd.f32 %v1356_v3, %v1192_v5 }
 0x2da   :  { %v1515_v9 = vpop.f32.mrf.mxu1 }
 0x2db   :  { %v1196_v10 = vpack.c.bf16 %v1193_v7, %v1190_v6  ;;  %v1365_v11 = vpack.c.bf16 %v1193_v7, %v1193_v7 }
 0x2dd   :  { %v1205_v12 = vrot.slane %v1196_v10, %v1204_v8  ;;  %v1212_v13 = vrot.slane %v1365_v11, %v1204_v8 }
 0x2df   :  { %v1213_v14 = vcombine.high %v1205_v12, %v1205_v12  ;;  %v1214_v15 = vcombine.high %v1212_v13, %v1212_v13  ;;  %v1221_v16 = vrot.slane %v1205_v12, %v1204_v8  ;;  %v1228_v17 = vrot.slane %v1212_v13, %v1204_v8  ;;  %1366 = vst.sshfl [vmem:[#allocation10] sm:$0x1 pattern:$0x73625140] %v1205_v12 }
 0x2e0   :  { %1368 = vst.sshfl [vmem:[#allocation10 + $0x4] sm:$0x1 pattern:$0x73625140] %v1212_v13 }
 0x2e1   :  { %v1235_v18 = vrot.slane %v1213_v14, %v1204_v8  ;;  %v1242_v19 = vrot.slane %v1214_v15, %v1204_v8  ;;  %v1243_v20 = vcombine.high %v1221_v16, %v1221_v16  ;;  %v1244_v21 = vcombine.high %v1228_v17, %v1228_v17  ;;  %1367 = vst.sshfl [vmem:[#allocation10 + $0x1] sm:$0x1 pattern:$0x73625140] %v1213_v14 }
 0x2e2   :  { %1369 = vst.sshfl [vmem:[#allocation10 + $0x5] sm:$0x1 pattern:$0x73625140] %v1214_v15 }
 0x2e3   :  { %v1245_v22 = vcombine.high %v1235_v18, %v1235_v18  ;;  %v1246_v23 = vcombine.high %v1242_v19, %v1242_v19  ;;  %1257 = vst [vmem:[#allocation10 + $0x2] sm:$0x1] %v1243_v20  ;;  %1261 = vst [vmem:[#allocation10 + $0x6] sm:$0x1] %v1244_v21 }
 0x2e5   :  { %1258 = vst [vmem:[#allocation10 + $0x3] sm:$0x1] %v1245_v22  ;;  %1262 = vst [vmem:[#allocation10 + $0x7] sm:$0x1] %v1246_v23 }
 0x2e6   :  { %1267 = vsyncadd [#allocation4], 112  ;;  %s1754_s4 = smov [#allocation10]  }
 0x2e7   :  { %s1268_s6 = sshll.u32 %s1754_s4, 4  ;;  %s1269_s6 = int_to_ptr.vmem [resolvable:$true] %s1268_s6 }
 0x2e8   :  { %s1714_s27 = scalar_lea.vmem %s1269_s6, 16  ;;  %s1718_s28 = scalar_lea.vmem %s1269_s6, 128 }
 0x2e9   :  { %p1715_p6 = scmp.ne.s32.totalorder %s1269_s6, %s1714_s27  ;;  %p1719_p7 = scmp.lt.s32.totalorder %s1269_s6, %s1269_s6 }
 0x2ea   :  { %p1720_p8 = scmp.lt.s32.totalorder %s1718_s28, %s1714_s27 }
 0x2ec   :  { %p1721_p9 = por %p1720_p8, %p1719_p7 }
 0x2ee   :  { %p1722_p10 = pnand %p1721_p9, %p1715_p6 }
 0x2f0   :  { %1725 = shalt.err (!%p1722_p10)
}
 0x2f1   :  { %s1755_s29 = smov 1  }
 0x2f2   :  { %1274 = dma.vmem_to_hbm [thread:$0]  %s1269_s6, 16, %s1879_s7, [#allocation4], %s1747_s13, %s1747_s13, %s1755_s29  }
 0x2f3   :  { %1740 = dma.done.wait [#allocation4], 128  }
 0x2f4   :  { %1741 = vsyncadd [#allocation4], 4294967168 }
 0x2f5   :  { %1278 = vsyncpa [#allocation3], 1 }
 0x2f6   :  { %1279 = vsyncpa [#allocation6], 1 }
 0x2f7   :  { %1280 = vsyncpa [#allocation9], 1 }
 0x2f8   :  { %1281 = vsyncpa [#allocation4], 1 }

</bundles_post_ra>
